<compile_context>
chip_gen: v7x
topology: tpu7x:2x2x1
jax: 0.10.0
libtpu: 0.0.40
codegen_flags: <defaults>
</compile_context>

<pallas_src>
import jax
import jax.numpy as jnp
from jax.experimental import pallas as pl
from jax.experimental.pallas import tpu as pltpu


def _head_kernel(x_ref,
                 w1_ref, b1_ref,
                 w2_ref, b2_ref,
                 wh_ref, bh_ref,
                 o_ref):
    ML, C = x_ref.shape            # ML = TB * L  (batch-block rows, MXU M dim)
    TB, NCP = o_ref.shape
    L = ML // TB

    def swish(h):
        # h * sigmoid(h) == h / (1 + exp(-h)); exp + approx-recip live on the EUP slot.
        return h * pl.reciprocal(1.0 + jnp.exp(-h), approx=True)

    x = x_ref[...].astype(jnp.bfloat16)                       # cast hidden under MXU

    # --- att_mlp layer 1: Linear(C,C) [BN folded] -> MemoryEfficientSwish ---
    h = jnp.dot(x, w1_ref[...], preferred_element_type=jnp.float32) + b1_ref[...]
    h = swish(h)                                              # (TB*L, C) f32

    # --- att_mlp layer 2: Linear(C,H) [BN folded] -> MemoryEfficientSwish ---
    h = jnp.dot(h.astype(jnp.bfloat16), w2_ref[...],
                preferred_element_type=jnp.float32) + b2_ref[...]
    h = swish(h)                                              # (TB*L, H) f32

    # --- AdaptiveAvgPool1d(1) over L: pure sum (the 1/L is folded into wh) ---
    pooled = jnp.sum(h.reshape(TB, L, -1), axis=1)            # (TB, H) f32

    # --- head: Linear(H, NC), lane-padded to NCP.  Dropout(dp=0) == Identity ---
    out = jnp.dot(pooled.astype(jnp.bfloat16), wh_ref[...],
                  preferred_element_type=jnp.float32) + bh_ref[...]
    o_ref[...] = out.astype(o_ref.dtype)


def _choose_tb(B, L):
    """Batch-block size: ~512 MXU rows/step; >=2 grid steps when batch allows."""
    rows_target = 512
    tb = max(1, rows_target // L)
    if tb >= B:
        if B >= 16:
            # Whole batch would fit in one fat step; split so the parallel batch
            # axis has >=2 programs (both TensorCores busy on v7x).
            tb = max(8, ((B // 2) // 8) * 8)
        else:
            tb = B                            # small batch: one full-extent step
    else:
        tb = max(8, (tb // 8) * 8)            # keep blocks sublane(8)-aligned
    return tb


def classification_head(x, params):
    """x: (B, L, C) float32 -> (B, num_classes) float32 (eval-mode BN, dp=0)."""
    B, L, C = x.shape
    w1, b1, s1, t1, w2, b2, s2, t2, wh, bh = params
    H = w2.shape[1]
    NC = wh.shape[1]

    # Fold eval-mode BN into the preceding Linear: (xW + b)*s + t = x(W*s) + (b*s + t)
    w1f = (w1 * s1).astype(jnp.bfloat16)
    b1f = (b1 * s1 + t1).astype(jnp.float32)
    w2f = (w2 * s2).astype(jnp.bfloat16)
    b2f = (b2 * s2 + t2).astype(jnp.float32)

    # Lane-pad the classifier to a multiple of 128 and fold the 1/L pooling scale in.
    NCP = ((NC + 127) // 128) * 128
    whp = jnp.zeros((H, NCP), jnp.bfloat16).at[:, :NC].set((wh / L).astype(jnp.bfloat16))
    bhp = jnp.zeros((1, NCP), jnp.float32).at[:, :NC].set(bh)

    TB = _choose_tb(B, L)
    Bp = ((B + TB - 1) // TB) * TB
    xb = x
    if Bp != B:
        # Tail rows are row-independent through all three matmuls and the
        # per-sample L-pooling; the wrapper slices them off.
        xb = jnp.pad(xb, ((0, Bp - B), (0, 0), (0, 0)))
    x2d = xb.reshape(Bp * L, C)                # contiguous reshape: layout plumbing only
    n_steps = Bp // TB

    # Grid-invariant operands: single-buffered, loaded once, VMEM resident.
    resident = lambda shape: pl.BlockSpec(shape, lambda b: (0,) * len(shape),
                                          pipeline_mode=pl.Buffered(1))

    # Scoped-VMEM budget: single-buffered weights + 2x streamed x/out + f32 temps,
    # with 1.5x headroom, clamped to [16 MiB, 64 MiB] (valid on v5e/v6e/v7x).
    w_bytes = 2 * (w1f.size + w2f.size + whp.size) + 4 * (b1f.size + b2f.size + bhp.size)
    s_bytes = 2 * (TB * L * C * 4 + TB * NCP * 4)
    a_bytes = 3 * (TB * L * max(C, H) * 4)
    vmem_limit = int(min(64 * 2**20, max(16 * 2**20, 1.5 * (w_bytes + s_bytes + a_bytes))))

    out = pl.pallas_call(
        _head_kernel,
        out_shape=jax.ShapeDtypeStruct((Bp, NCP), jnp.float32),
        grid_spec=pltpu.PrefetchScalarGridSpec(
            num_scalar_prefetch=0,
            grid=(n_steps,),
            in_specs=[
                pl.BlockSpec((TB * L, C), lambda b: (b, 0)),    # streamed activations (f32)
                resident((C, C)), resident((1, C)),             # Linear1 (BN folded)
                resident((C, H)), resident((1, H)),             # Linear2 (BN folded)
                resident((H, NCP)), resident((1, NCP)),         # head (lane-padded, /L folded)
            ],
            out_specs=pl.BlockSpec((TB, NCP), lambda b: (b, 0)),
        ),
        compiler_params=pltpu.CompilerParams(
            dimension_semantics=("parallel",),
            vmem_limit_bytes=vmem_limit),
    )(x2d, w1f, b1f, w2f, b2f, whp, bhp)

    return out[:B, :NC]


def init_params(key, embed_dim, hidden_dim, num_classes):
    """Deterministic init matching the module's _init_weights (trunc_normal
    std=0.02 for Linear weights, zero biases; BN gamma=1, beta=0,
    running_mean=0, running_var=1)."""
    eps = 1e-5
    k1, k2, k3 = jax.random.split(key, 3)

    def trunc(k, shape):
        return 0.02 * jax.random.truncated_normal(k, -2.0, 2.0, shape, jnp.float32)

    # Linear weights stored as (in, out)  (PyTorch stores (out, in); we use x @ W)
    w1 = trunc(k1, (embed_dim, embed_dim))
    b1 = jnp.zeros((1, embed_dim), jnp.float32)
    w2 = trunc(k2, (embed_dim, hidden_dim))
    b2 = jnp.zeros((1, hidden_dim), jnp.float32)
    wh = trunc(k3, (hidden_dim, num_classes))
    bh = jnp.zeros((1, num_classes), jnp.float32)

    # BatchNorm1d eval-mode fold: scale = gamma / sqrt(var + eps), shift = beta - mean*scale
    def bn_fold(dim):
        gamma = jnp.ones((1, dim), jnp.float32)
        beta = jnp.zeros((1, dim), jnp.float32)
        rmean = jnp.zeros((1, dim), jnp.float32)
        rvar = jnp.ones((1, dim), jnp.float32)
        scale = gamma / jnp.sqrt(rvar + eps)
        shift = beta - rmean * scale
        return scale, shift

    s1, t1 = bn_fold(embed_dim)
    s2, t2 = bn_fold(hidden_dim)

    return (w1, b1, s1, t1, w2, b2, s2, t2, wh, bh)


def reference(x, params):
    """Pure-JAX f32 reference of the PyTorch forward (eval-mode BN, dp=0)."""
    w1, b1, s1, t1, w2, b2, s2, t2, wh, bh = params
    B, L, C = x.shape
    h = x.reshape(-1, C)
    h = h @ w1 + b1
    h = h * s1 + t1
    h = h * jax.nn.sigmoid(h)
    h = h @ w2 + b2
    h = h * s2 + t2
    h = h * jax.nn.sigmoid(h)
    h = h.reshape(B, L, -1)
    h = jnp.transpose(h, (0, 2, 1))          # B L C -> B C L
    h = jnp.mean(h, axis=-1)                 # AdaptiveAvgPool1d(1) + squeeze
    return h @ wh + bh


if __name__ == "__main__":
    B, L = 2, 8
    embed_dim, hidden_dim, num_classes = 32, 64, 10

    key = jax.random.PRNGKey(0)
    kx, kp = jax.random.split(key)
    x = jax.random.normal(kx, (B, L, embed_dim), jnp.float32)
    params = init_params(kp, embed_dim, hidden_dim, num_classes)

    out = classification_head(x, params)
    out = jax.block_until_ready(out)

    ref = reference(x, params)
    assert out.shape == (B, num_classes), out.shape
    # bf16 MXU path + approx reciprocal vs f32 reference: normalized max error.
    err = float(jnp.max(jnp.abs(out - ref)) / (jnp.max(jnp.abs(ref)) + 1e-8))
    assert err < 0.05, (err, out, ref)

    print("KERNEL_OK")
</pallas_src>

<mosaic_0001>
module attributes {stable_mosaic.version = 11 : i64} {
  func.func @_head_kernel(%arg0: i32, %arg1: memref<16x32xf32, #tpu.memory_space<vmem>>, %arg2: memref<32x32xbf16, #tpu.memory_space<vmem>>, %arg3: memref<1x32xf32, #tpu.memory_space<vmem>>, %arg4: memref<32x64xbf16, #tpu.memory_space<vmem>>, %arg5: memref<1x64xf32, #tpu.memory_space<vmem>>, %arg6: memref<64x128xbf16, #tpu.memory_space<vmem>>, %arg7: memref<1x128xf32, #tpu.memory_space<vmem>>, %arg8: memref<2x128xf32, #tpu.memory_space<vmem>>) attributes {dimension_semantics = [#tpu.dimension_semantics<parallel>], iteration_bounds = array<i64: 1>, scalar_prefetch = 0 : i64, scratch_operands = 0 : i64, tpu.core_type = #tpu.core_type<tc>, window_params = [{transform_indices = @transform_0, window_bounds = array<i64: 16, 32>}, {pipeline_mode = #tpu.pipeline_mode<synchronous>, transform_indices = @transform_1, window_bounds = array<i64: 32, 32>}, {pipeline_mode = #tpu.pipeline_mode<synchronous>, transform_indices = @transform_2, window_bounds = array<i64: 1, 32>}, {pipeline_mode = #tpu.pipeline_mode<synchronous>, transform_indices = @transform_3, window_bounds = array<i64: 32, 64>}, {pipeline_mode = #tpu.pipeline_mode<synchronous>, transform_indices = @transform_4, window_bounds = array<i64: 1, 64>}, {pipeline_mode = #tpu.pipeline_mode<synchronous>, transform_indices = @transform_5, window_bounds = array<i64: 64, 128>}, {pipeline_mode = #tpu.pipeline_mode<synchronous>, transform_indices = @transform_6, window_bounds = array<i64: 1, 128>}, {transform_indices = @transform_7, window_bounds = array<i64: 2, 128>}]} {
    %c0 = arith.constant 0 : index
    %c0_0 = arith.constant 0 : index
    %0 = vector.load %arg1[%c0, %c0_0] : memref<16x32xf32, #tpu.memory_space<vmem>>, vector<16x32xf32>
    %1 = arith.truncf %0 : vector<16x32xf32> to vector<16x32xbf16>
    %c0_1 = arith.constant 0 : index
    %c0_2 = arith.constant 0 : index
    %2 = vector.load %arg2[%c0_1, %c0_2] : memref<32x32xbf16, #tpu.memory_space<vmem>>, vector<32x32xbf16>
    %cst = arith.constant dense<0.000000e+00> : vector<16x32xf32>
    %3 = tpu.matmul %1, %2, %cst {dimension_numbers = #tpu.dot_dimension_numbers<[1], [0], [0], [1], [0, 0, 1, 1], [], []>} : vector<16x32xbf16>, vector<32x32xbf16>, vector<16x32xf32> -> vector<16x32xf32>
    %c0_3 = arith.constant 0 : index
    %c0_4 = arith.constant 0 : index
    %4 = vector.load %arg3[%c0_3, %c0_4] : memref<1x32xf32, #tpu.memory_space<vmem>>, vector<1x32xf32>
    %5 = vector.broadcast %4 : vector<1x32xf32> to vector<16x32xf32>
    %6 = arith.addf %3, %5 : vector<16x32xf32>
    %cst_5 = arith.constant 0.000000e+00 : f32
    %7 = vector.broadcast %cst_5 : f32 to vector<16x32xf32>
    %8 = arith.subf %7, %6 : vector<16x32xf32>
    %9 = math.exp %8 : vector<16x32xf32>
    %cst_6 = arith.constant 1.000000e+00 : f32
    %10 = vector.broadcast %cst_6 : f32 to vector<16x32xf32>
    %11 = arith.addf %10, %9 : vector<16x32xf32>
    %12 = tpu.reciprocal %11 {approx = true} : vector<16x32xf32> -> vector<16x32xf32>
    %13 = arith.mulf %6, %12 : vector<16x32xf32>
    %14 = arith.truncf %13 : vector<16x32xf32> to vector<16x32xbf16>
    %c0_7 = arith.constant 0 : index
    %c0_8 = arith.constant 0 : index
    %15 = vector.load %arg4[%c0_7, %c0_8] : memref<32x64xbf16, #tpu.memory_space<vmem>>, vector<32x64xbf16>
    %cst_9 = arith.constant dense<0.000000e+00> : vector<16x64xf32>
    %16 = tpu.matmul %14, %15, %cst_9 {dimension_numbers = #tpu.dot_dimension_numbers<[1], [0], [0], [1], [0, 0, 1, 1], [], []>} : vector<16x32xbf16>, vector<32x64xbf16>, vector<16x64xf32> -> vector<16x64xf32>
    %c0_10 = arith.constant 0 : index
    %c0_11 = arith.constant 0 : index
    %17 = vector.load %arg5[%c0_10, %c0_11] : memref<1x64xf32, #tpu.memory_space<vmem>>, vector<1x64xf32>
    %18 = vector.broadcast %17 : vector<1x64xf32> to vector<16x64xf32>
    %19 = arith.addf %16, %18 : vector<16x64xf32>
    %cst_12 = arith.constant 0.000000e+00 : f32
    %20 = vector.broadcast %cst_12 : f32 to vector<16x64xf32>
    %21 = arith.subf %20, %19 : vector<16x64xf32>
    %22 = math.exp %21 : vector<16x64xf32>
    %cst_13 = arith.constant 1.000000e+00 : f32
    %23 = vector.broadcast %cst_13 : f32 to vector<16x64xf32>
    %24 = arith.addf %23, %22 : vector<16x64xf32>
    %25 = tpu.reciprocal %24 {approx = true} : vector<16x64xf32> -> vector<16x64xf32>
    %26 = arith.mulf %19, %25 : vector<16x64xf32>
    %27 = vector.shape_cast %26 : vector<16x64xf32> to vector<2x8x64xf32>
    %cst_14 = arith.constant dense<0.000000e+00> : vector<2x64xf32>
    %28 = vector.multi_reduction <add>, %27, %cst_14 [1] : vector<2x8x64xf32> to vector<2x64xf32>
    %29 = arith.truncf %28 : vector<2x64xf32> to vector<2x64xbf16>
    %c0_15 = arith.constant 0 : index
    %c0_16 = arith.constant 0 : index
    %30 = vector.load %arg6[%c0_15, %c0_16] : memref<64x128xbf16, #tpu.memory_space<vmem>>, vector<64x128xbf16>
    %cst_17 = arith.constant dense<0.000000e+00> : vector<2x128xf32>
    %31 = tpu.matmul %29, %30, %cst_17 {dimension_numbers = #tpu.dot_dimension_numbers<[1], [0], [0], [1], [0, 0, 1, 1], [], []>} : vector<2x64xbf16>, vector<64x128xbf16>, vector<2x128xf32> -> vector<2x128xf32>
    %c0_18 = arith.constant 0 : index
    %c0_19 = arith.constant 0 : index
    %32 = vector.load %arg7[%c0_18, %c0_19] : memref<1x128xf32, #tpu.memory_space<vmem>>, vector<1x128xf32>
    %33 = vector.broadcast %32 : vector<1x128xf32> to vector<2x128xf32>
    %34 = arith.addf %31, %33 : vector<2x128xf32>
    %c0_20 = arith.constant 0 : index
    %c0_21 = arith.constant 0 : index
    %35 = vector.load %arg8[%c0_20, %c0_21] : memref<2x128xf32, #tpu.memory_space<vmem>>, vector<2x128xf32>
    tpu.vector_store %arg8[%c0_20, %c0_21], %34 {strides = array<i32>} : memref<2x128xf32, #tpu.memory_space<vmem>>, vector<2x128xf32>,
    return
  }
  func.func @transform_0(%arg0: i32) -> (i32, i32) {
    %c0_i32 = arith.constant 0 : i32
    %c0_i32_0 = arith.constant 0 : i32
    return %arg0, %c0_i32 : i32, i32
  }
  func.func @transform_1(%arg0: i32) -> (i32, i32) {
    %c0_i32 = arith.constant 0 : i32
    %c0_i32_0 = arith.constant 0 : i32
    %c0_i32_1 = arith.constant 0 : i32
    return %c0_i32, %c0_i32_0 : i32, i32
  }
  func.func @transform_2(%arg0: i32) -> (i32, i32) {
    %c0_i32 = arith.constant 0 : i32
    %c0_i32_0 = arith.constant 0 : i32
    %c0_i32_1 = arith.constant 0 : i32
    return %c0_i32, %c0_i32_0 : i32, i32
  }
  func.func @transform_3(%arg0: i32) -> (i32, i32) {
    %c0_i32 = arith.constant 0 : i32
    %c0_i32_0 = arith.constant 0 : i32
    %c0_i32_1 = arith.constant 0 : i32
    return %c0_i32, %c0_i32_0 : i32, i32
  }
  func.func @transform_4(%arg0: i32) -> (i32, i32) {
    %c0_i32 = arith.constant 0 : i32
    %c0_i32_0 = arith.constant 0 : i32
    %c0_i32_1 = arith.constant 0 : i32
    return %c0_i32, %c0_i32_0 : i32, i32
  }
  func.func @transform_5(%arg0: i32) -> (i32, i32) {
    %c0_i32 = arith.constant 0 : i32
    %c0_i32_0 = arith.constant 0 : i32
    %c0_i32_1 = arith.constant 0 : i32
    return %c0_i32, %c0_i32_0 : i32, i32
  }
  func.func @transform_6(%arg0: i32) -> (i32, i32) {
    %c0_i32 = arith.constant 0 : i32
    %c0_i32_0 = arith.constant 0 : i32
    %c0_i32_1 = arith.constant 0 : i32
    return %c0_i32, %c0_i32_0 : i32, i32
  }
  func.func @transform_7(%arg0: i32) -> (i32, i32) {
    %c0_i32 = arith.constant 0 : i32
    %c0_i32_0 = arith.constant 0 : i32
    return %arg0, %c0_i32 : i32, i32
  }
}

</mosaic_0001>

<bundles_post_ra>
// kernel: tpu_custom_call.1
= control target key start
LH: loop header
LB: loop body
LE: loop exit
PB: predicated region body
PF: predicated region fallthrough
CT: control target
= control target key end

     0   :  { %12 = vsyncpa [#allocation3], 0  ;;  %s717_s0 = inlined_call_operand.hbm [shape: f32[16,32], index: 0, kind: input, shape index: {}]   ;;  %s718_s1 = inlined_call_operand.hbm [shape: bf16[32,32], index: 1, kind: input, shape index: {}]   ;;  %s719_s2 = inlined_call_operand.vmem [shape: f32[1,32], index: 2, kind: input, shape index: {}]   ;;  %s720_s3 = inlined_call_operand.hbm [shape: bf16[32,64], index: 3, kind: input, shape index: {}]   ;;  %s721_s4 = inlined_call_operand.vmem [shape: f32[1,64], index: 4, kind: input, shape index: {}]   ;;  %s722_s5 = inlined_call_operand.hbm [shape: bf16[64,128], index: 5, kind: input, shape index: {}]   ;;  %s723_s6 = inlined_call_operand.vmem [shape: f32[1,128], index: 6, kind: input, shape index: {}]   ;;  %s724_s7 = inlined_call_operand.hbm [shape: f32[2,128], index: 7, kind: output, shape index: {}]  }
   0x1   :  { %13 = vsyncpa [#allocation6], 0 }
   0x2   :  { %14 = vsyncpa [#allocation9], 0 }
   0x3   :  { %15 = vsyncpa [#allocation4], 0  ;;  %s576_s24 = smov [#allocation5]   ;;  %s458_s28 = scalar_lea.hbm %s718_s1, 256 }
   0x4   :  { %s33_s25 = sshll.u32 %s576_s24, 4  ;;  %p459_p0 = scmp.ne.s32.totalorder %s718_s1, %s458_s28  ;;  %s34_s25 = int_to_ptr.vmem [resolvable:$true] %s33_s25 }
   0x5   :  { %p462_p1 = scmp.lt.u32.totalorder %s458_s28, %s718_s1 }
   0x7   :  { %p464_p2 = pnand %p462_p1, %p459_p0 }
   0x9   :  { %467 = shalt.err (!%p464_p2)
}
   0xa   :  { %s468_s10 = scalar_lea.vmem %s34_s25, 256  ;;  %p473_p4 = scmp.lt.s32.totalorder %s34_s25, %s34_s25 }
   0xb   :  { %p469_p3 = scmp.ne.s32.totalorder %s34_s25, %s468_s10  ;;  %p474_p5 = scmp.lt.s32.totalorder %s468_s10, %s468_s10 }
   0xd   :  { %p475_p6 = por %p474_p5, %p473_p4 }
   0xf   :  { %p476_p7 = pnand %p475_p6, %p469_p3 }
  0x11   :  { %479 = shalt.err (!%p476_p7)
}
  0x12   :  { %s577_s11 = smov 64   ;;  %s578_s12 = smov 4  }
  0x13   :  { %39 = dma.hbm_to_vmem [thread:$0]  %s718_s1, 256, %s34_s25, [#allocation6], %s577_s11, %s577_s11, %s578_s12  }
  0x14   :  { %s579_s15 = smov [#allocation2]   ;;  %s480_s19 = scalar_lea.hbm %s717_s0, 256 }
  0x15   :  { %s21_s16 = sshll.u32 %s579_s15, 4  ;;  %p481_p8 = scmp.ne.s32.totalorder %s717_s0, %s480_s19  ;;  %s22_s16 = int_to_ptr.vmem [resolvable:$true] %s21_s16 }
  0x16   :  { %p484_p9 = scmp.lt.u32.totalorder %s480_s19, %s717_s0 }
  0x18   :  { %p486_p10 = pnand %p484_p9, %p481_p8 }
  0x1a   :  { %489 = shalt.err (!%p486_p10)
}
  0x1b   :  { %s490_s24 = scalar_lea.vmem %s22_s16, 256  ;;  %p495_p12 = scmp.lt.s32.totalorder %s22_s16, %s22_s16 }
  0x1c   :  { %p491_p11 = scmp.ne.s32.totalorder %s22_s16, %s490_s24  ;;  %p496_p13 = scmp.lt.s32.totalorder %s490_s24, %s490_s24 }
  0x1e   :  { %p497_p0 = por %p496_p13, %p495_p12 }
  0x20   :  { %p498_p1 = pnand %p497_p0, %p491_p11 }
  0x22   :  { %501 = shalt.err (!%p498_p1)
}
  0x23   :  { %s580_s1 = smov 128   ;;  %s581_s25 = smov 8  }
  0x24   :  { %27 = dma.hbm_to_vmem [thread:$0]  %s717_s0, 256, %s22_s16, [#allocation3], %s580_s1, %s580_s1, %s581_s25  }
  0x25   :  { %s582_s28 = smov [#allocation7]   ;;  %s583_s30 = smov [#allocation8]  }
  0x26   :  { %s47_s29 = sshll.u32 %s582_s28, 4  ;;  %s61_s8 = sshll.u32 %s583_s30, 4  ;;  %s48_s29 = int_to_ptr.vmem [resolvable:$true] %s47_s29  ;;  %s654_s8 = int_to_ptr.vmem [resolvable:$true] %s61_s8 }
  0x27   :  { %s502_s13 = scalar_lea.hbm %s720_s3, 256 }
  0x28   :  { %p503_p2 = scmp.ne.s32.totalorder %s720_s3, %s502_s13  ;;  %p506_p3 = scmp.lt.u32.totalorder %s502_s13, %s720_s3 }
  0x2a   :  { %p508_p4 = pnand %p506_p3, %p503_p2 }
  0x2c   :  { %511 = shalt.err (!%p508_p4)
}
  0x2d   :  { %s512_s0 = scalar_lea.vmem %s48_s29, 256  ;;  %p517_p6 = scmp.lt.s32.totalorder %s48_s29, %s48_s29 }
  0x2e   :  { %p513_p5 = scmp.ne.s32.totalorder %s48_s29, %s512_s0  ;;  %p518_p7 = scmp.lt.s32.totalorder %s512_s0, %s512_s0 }
  0x30   :  { %p519_p8 = por %p518_p7, %p517_p6 }
  0x32   :  { %p520_p9 = pnand %p519_p8, %p513_p5 }
  0x34   :  { %523 = shalt.err (!%p520_p9)
}
  0x35   :  { %53 = dma.hbm_to_vmem [thread:$0]  %s720_s3, 256, %s48_s29, [#allocation6], %s577_s11, %s577_s11, %s578_s12  }
  0x36   :  { %s524_s22 = scalar_lea.hbm %s722_s5, 512 }
  0x37   :  { %p525_p10 = scmp.ne.s32.totalorder %s722_s5, %s524_s22  ;;  %p528_p11 = scmp.lt.u32.totalorder %s524_s22, %s722_s5 }
  0x39   :  { %p530_p12 = pnand %p528_p11, %p525_p10 }
  0x3b   :  { %533 = shalt.err (!%p530_p12)
}
  0x3c   :  { %s534_s26 = scalar_lea.vmem %s654_s8, 512  ;;  %p539_p0 = scmp.lt.s32.totalorder %s654_s8, %s654_s8 }
  0x3d   :  { %p535_p13 = scmp.ne.s32.totalorder %s654_s8, %s534_s26  ;;  %p540_p1 = scmp.lt.s32.totalorder %s534_s26, %s534_s26 }
  0x3f   :  { %p541_p2 = por %p540_p1, %p539_p0 }
  0x41   :  { %p542_p3 = pnand %p541_p2, %p535_p13 }
  0x43   :  { %545 = shalt.err (!%p542_p3)
}
  0x44   :  { %67 = dma.hbm_to_vmem [thread:$0]  %s722_s5, 512, %s654_s8, [#allocation9], %s577_s11, %s577_s11, %s578_s12  }
  0x45   :  { %568 = dma.done.wait [#allocation3], 256  }
  0x46   :  { %569 = vsyncadd [#allocation3], 4294967040 }
  0x47   :  { %570 = dma.done.wait [#allocation6], 512  }
  0x48   :  { %571 = vsyncadd [#allocation6], 4294966784 }
  0x49   :  { %572 = dma.done.wait [#allocation9], 512  }
  0x4a   :  { %573 = vsyncadd [#allocation9], 4294966784  ;;  %v584_v0 = vmov 0.0   ;;  %vm585_vm0 = vmmov 0   ;;  %v434_v1 = vld [vmem:[#allocation5] sm:$0xff]   ;;  %v435_v2 = vld [vmem:[#allocation5 + $0x8] sm:$0xff]  }
  0x4b   :  { %395 = vmatprep.subr.bf16.mxu1 %v584_v0  ;;  %399 = vmatprep.mubr.msk.bf16.mxu1 %vm585_vm0, %v584_v0  ;;  %v83_v3 = vld [vmem:[#allocation2] sm:$0xff]  ;;  %v84_v4 = vld [vmem:[#allocation2 + $0x8] sm:$0xff]  ;;  %vm109_vm1 = vcmask 261120   ;;  %v438_v28 = vld [vmem:[#allocation8] sm:$0xff]   ;;  %vm246_vm2 = vcmask 523264   ;;  %vm282_vm3 = vcmask 1041409  }
  0x4c   :  { %411 = vmatprep.subr.bf16.mxu0 %v584_v0  ;;  %419 = vmatprep.mubr.msk.bf16.mxu0 %vm585_vm0, %v584_v0  ;;  %v85_v5 = vpack.c.bf16 %v84_v4, %v83_v3  ;;  %v436_v6 = vld [vmem:[#allocation7] sm:$0xff]   ;;  %v437_v7 = vld [vmem:[#allocation7 + $0x8] sm:$0xff]   ;;  %v439_v29 = vld [vmem:[#allocation8 + $0x8] sm:$0xff]   ;;  %s586_s29 = smov [#allocation10]  }
  0x4d   :  { %396 = vmatpush3.bf16.msra.mxu1 %v434_v1  ;;  %v370_v8 = vld [vmem:[%s719_s2] ss:$0 sm:$0xff]  ;;  %412 = vmatpush3.bf16.msra.mxu0 %v438_v28  ;;  %v441_v31 = vld [vmem:[#allocation8 + $0x18] sm:$0xff]   ;;  %s359_s30 = sshll.u32 %s586_s29, 4  ;;  %s360_s30 = int_to_ptr.vmem [resolvable:$true] %s359_s30 }
  0x4e   :  { %397 = vmatprep.subr.bf16.mxu1 %v584_v0  ;;  %413 = vmatprep.subr.bf16.mxu0 %v584_v0  ;;  %v440_v30 = vld [vmem:[#allocation8 + $0x10] sm:$0xff]   ;;  %s546_s8 = scalar_lea.vmem %s360_s30, 32  ;;  %p551_p5 = scmp.lt.s32.totalorder %s360_s30, %s360_s30 }
  0x4f   :  { %v374_v32 = vld [vmem:[%s721_s4] ss:$0 sm:$0xff]  ;;  %p547_p4 = scmp.ne.s32.totalorder %s360_s30, %s546_s8  ;;  %p552_p6 = scmp.lt.s32.totalorder %s546_s8, %s546_s8 }
  0x51   :  { %398 = vmatpush3.bf16.msra.mxu1 %v435_v2  ;;  %414 = vmatpush3.bf16.msra.mxu0 %v439_v29  ;;  %p553_p7 = por %p552_p6, %p551_p5 }
  0x52   :  { %403 = vmatprep.subr.bf16.mxu1 %v584_v0  ;;  %415 = vmatprep.subr.bf16.mxu0 %v584_v0 }
  0x53   :  { %p554_p8 = pnand %p553_p7, %p547_p4 }
  0x54   :  { %400 = vmatmul.mubr.msk.bf16.vlgmr.msra.gmra.mrb[0].mxu1 %vm109_vm1, %v85_v5 }
  0x55   :  { %407 = vmatprep.mubr.msk.bf16.mxu1 %vm585_vm0, %v584_v0  ;;  %404 = vmatpush3.bf16.msra.mxu1 %v436_v6 }
  0x56   :  { %405 = vmatprep.subr.bf16.mxu1 %v584_v0  ;;  %416 = vmatpush3.bf16.msra.mxu0 %v440_v30 }
  0x57   :  { %417 = vmatprep.subr.bf16.mxu0 %v584_v0 }
  0x59   :  { %406 = vmatpush3.bf16.msra.mxu1 %v437_v7  ;;  %v378_v7 = vld [vmem:[%s723_s6] ss:$0 sm:$0xff] }
  0x5a   :  { %418 = vmatpush3.bf16.msra.mxu0 %v441_v31 }
 0x127   :  { %v147_v9 = vpop.f32.mrb[0].mxu1 }
 0x128   :  { %v148_v10 = vadd.f32 %v370_v8, %v147_v9  ;;  %v401_v11 = vpop.f32.mrb[1].mxu1 }
 0x129   :  { %v150_v12 = vpop.f32.mrb[2].mxu1 }
 0x12a   :  { %v154_v13 = vsub.f32 0.0, %v148_v10  ;;  %v151_v14 = vadd.f32 %v370_v8, %v150_v12  ;;  %v402_v15 = vpop.f32.mrb[3].mxu1 }
 0x12c   :  { %v156_v16 = vmul.f32 1.442695, %v154_v13  ;;  %v155_v17 = vsub.f32 0.0, %v151_v14 }
 0x12e   :  { %442 = vpow2.f32 %v156_v16  ;;  %v158_v18 = vmul.f32 1.442695, %v155_v17 }
 0x130   :  { %444 = vpow2.f32 %v158_v18 }
 0x138   :  { %v443_v19 = vpop.eup %442 }
 0x139   :  { %v160_v20 = vadd.f32 1.0, %v443_v19 }
 0x13a   :  { %v445_v21 = vpop.eup %444 }
 0x13b   :  { %446 = vrcp.f32 %v160_v20  ;;  %v161_v22 = vadd.f32 1.0, %v445_v21 }
 0x13d   :  { %448 = vrcp.f32 %v161_v22 }
 0x145   :  { %v447_v23 = vpop.eup %446 }
 0x146   :  { %v164_v25 = vmul.f32 %v447_v23, %v148_v10 }
 0x147   :  { %v449_v24 = vpop.eup %448 }
 0x148   :  { %v165_v26 = vmul.f32 %v449_v24, %v151_v14 }
 0x14a   :  { %v166_v27 = vpack.c.bf16 %v165_v26, %v164_v25 }
 0x14c   :  { %408 = vmatmul.mubr.msk.bf16.vlgmr.msra.gmra.mrb[4].mxu1 %vm109_vm1, %v166_v27 }
 0x21f   :  { %v227_v33 = vpop.f32.mrb[4].mxu1 }
 0x220   :  { %v228_v34 = vadd.f32 %v374_v32, %v227_v33  ;;  %v409_v35 = vpop.f32.mrb[5].mxu1 }
 0x221   :  { %v230_v36 = vpop.f32.mrb[6].mxu1 }
 0x222   :  { %v234_v37 = vsub.f32 0.0, %v228_v34  ;;  %v231_v38 = vadd.f32 %v374_v32, %v230_v36  ;;  %v410_v39 = vpop.f32.mrb[7].mxu1 }
 0x224   :  { %v236_v40 = vmul.f32 1.442695, %v234_v37  ;;  %v235_v41 = vsub.f32 0.0, %v231_v38 }
 0x226   :  { %450 = vpow2.f32 %v236_v40  ;;  %v238_v42 = vmul.f32 1.442695, %v235_v41 }
 0x228   :  { %452 = vpow2.f32 %v238_v42 }
 0x230   :  { %v451_v43 = vpop.eup %450 }
 0x231   :  { %v240_v44 = vadd.f32 1.0, %v451_v43 }
 0x232   :  { %v453_v45 = vpop.eup %452 }
 0x233   :  { %454 = vrcp.f32 %v240_v44  ;;  %v241_v46 = vadd.f32 1.0, %v453_v45 }
 0x235   :  { %456 = vrcp.f32 %v241_v46 }
 0x23d   :  { %v455_v47 = vpop.eup %454 }
 0x23e   :  { %v244_v48 = vmul.f32 %v455_v47, %v228_v34 }
 0x23f   :  { %v457_v49 = vpop.eup %456 }
 0x240   :  { %v245_v50 = vmul.f32 %v457_v49, %v231_v38  ;;  %v247_v51 = vsel %vm246_vm2, %v244_v48, 0.0 }
 0x241   :  { %v248_v52 = vrot.slane %v247_v51, 4 }
 0x242   :  { %v254_v53 = vsel %vm246_vm2, %v245_v50, 0.0 }
 0x243   :  { %v249_v54 = vadd.f32 %v248_v52, %v247_v51  ;;  %v255_v55 = vrot.slane %v254_v53, 4 }
 0x245   :  { %v250_v56 = vrot.slane %v249_v54, 2  ;;  %v256_v57 = vadd.f32 %v255_v55, %v254_v53 }
 0x247   :  { %v251_v58 = vadd.f32 %v250_v56, %v249_v54  ;;  %v257_v59 = vrot.slane %v256_v57, 2 }
 0x249   :  { %v252_v60 = vrot.slane %v251_v58, 1  ;;  %v258_v61 = vadd.f32 %v257_v59, %v256_v57 }
 0x24b   :  { %v253_v62 = vadd.f32 %v252_v60, %v251_v58  ;;  %v259_v63 = vrot.slane %v258_v61, 1 }
 0x24d   :  { %v260_v0 = vadd.f32 %v259_v63, %v258_v61  ;;  %v261_v1 = vpack.c.bf16 %v253_v62, %v253_v62 }
 0x24f   :  { %v262_v2 = vpack.c.bf16 %v260_v0, %v260_v0  ;;  %v280_v3 = vunpack.c.l.b16 %v261_v1 }
 0x251   :  { %v281_v4 = vunpack.c.l.b16 %v262_v2 }
 0x253   :  { %v283_v5 = vsel %vm282_vm3, %v281_v4, %v280_v3 }
 0x254   :  { %v284_v6 = vpack.c.b16 %v283_v5, %v283_v5 }
 0x256   :  { %420 = vmatmul.mubr.msk.bf16.vlgmr.msra.gmra.mrb[0].mxu0 %vm246_vm2, %v284_v6 }
 0x329   :  { %v346_v8 = vpop.f32.mrb[0].mxu0 }
 0x32a   :  { %v347_v9 = vadd.f32 %v378_v7, %v346_v8  ;;  %v421_v10 = vpop.f32.mrb[1].mxu0 }
 0x32b   :  { %v349_v11 = vpop.f32.mrb[2].mxu0 }
 0x32c   :  { %352 = vst [vmem:[#allocation10] sm:$0x3] %v347_v9  ;;  %v422_v12 = vpop.f32.mrb[3].mxu0 }
 0x32d   :  { %557 = shalt.err (!%p554_p8)
}
 0x32e   :  { %s558_s6 = scalar_lea.hbm %s724_s7, 32 }
 0x32f   :  { %p559_p9 = scmp.ne.s32.totalorder %s724_s7, %s558_s6  ;;  %p562_p10 = scmp.lt.u32.totalorder %s558_s6, %s724_s7 }
 0x331   :  { %p564_p11 = pnand %p562_p10, %p559_p9 }
 0x333   :  { %567 = shalt.err (!%p564_p11)
}
 0x334   :  { %362 = dma.vmem_to_hbm [thread:$0]  %s360_s30, 32, %s724_s7, [#allocation4]  }
 0x335   :  { %574 = dma.done.wait [#allocation4], 32  }
 0x336   :  { %575 = vsyncadd [#allocation4], 4294967264 }
 0x337   :  { %366 = vsyncpa [#allocation3], 1 }
 0x338   :  { %367 = vsyncpa [#allocation6], 1 }
 0x339   :  { %368 = vsyncpa [#allocation9], 1 }
 0x33a   :  { %369 = vsyncpa [#allocation4], 1 }

</bundles_post_ra>
